<compile_context>
chip_gen: v7x
topology: tpu7x:2x2x1
jax: 0.10.0
libtpu: 0.0.40
codegen_flags: <defaults>
</compile_context>

<pallas_src>
import functools
import math

import jax
import jax.numpy as jnp
from jax.experimental import pallas as pl
from jax.experimental.pallas import tpu as pltpu

EPS = 1e-8


# ----------------------------------------------------------------------------
# Pallas kernels
# ----------------------------------------------------------------------------
def _query_linear_kernel(q_ref, w_ref, b_ref, o_ref):
    # q: [MT, E] f32, w: [E, 2H] bf16 (linear_a|linear_b fused), b: [1, 2H] f32.
    o_ref[...] = jnp.dot(q_ref[...].astype(jnp.bfloat16), w_ref[...],
                         preferred_element_type=jnp.float32) + b_ref[...]


def _cond_dwsep_kernel(x_ref, wd_ref, a_ref, b_ref, alpha_ref, wpg_ref, biasp_ref,
                       o_ref, *, P, dil, pad_left, K_in, K_out, norm_type):
    """One (batch*topk) sample, fully fused.

    x_ref    : [H, Kb]  input tile (time axis zero-padded beyond K_in for lane alignment)
    wd_ref   : [H, P]   depthwise conv weight
    a_ref    : [H, 1]   conditioning scale  (linear_a(query))
    b_ref    : [H, 1]   conditioning bias   (linear_b(query))
    alpha_ref: [1, 1]   shared PReLU slope
    wpg_ref  : [B, H]   bf16 pointwise weight with LN gamma folded in
    biasp_ref: [B, 1]   pointwise_conv(LN beta) bias
    o_ref    : [B, Kb]  output tile (columns >= K_out are don't-care, sliced off outside)
    """
    H, Kb = x_ref.shape
    x = x_ref[...]
    col = jax.lax.broadcasted_iota(jnp.int32, (1, Kb), 1)

    # Fold the per-sample conditioning scale into the (tiny) depthwise taps.
    wda = a_ref[...] * wd_ref[...]                                   # [H, P]

    # Depthwise dilated conv: taps are lane rotations of x (XLU slot) with static
    # masks on the <= (P-1)*dil out-of-range boundary columns.  out[j] uses x[j + s].
    acc = None
    for p in range(P):
        s = p * dil - pad_left
        v = x if s == 0 else pltpu.roll(x, (-s) % Kb, 1)             # v[:, j] = x[:, (j + s) % Kb]
        need_lo = s < 0                 # j < -s would read left of the input
        need_hi = (K_in - s) < Kb       # j >= K_in - s would read right of it / wrap
        if need_lo and need_hi:
            v = jnp.where(jnp.logical_and(col >= -s, col < K_in - s), v, 0.0)
        elif need_lo:
            v = jnp.where(col >= -s, v, 0.0)
        elif need_hi:
            v = jnp.where(col < K_in - s, v, 0.0)
        t = wda[:, p:p + 1] * v
        acc = t if acc is None else acc + t

    # Conditioning bias + PReLU (single shared slope).
    z = acc + b_ref[...]
    z = jnp.where(z >= 0.0, z, alpha_ref[...] * z)

    # Columns >= K_out only exist for lane alignment; keep them out of the stats.
    if K_out < Kb:
        live = col < K_out
        z = jnp.where(live, z, 0.0)

    # LayerNorm statistics (z stays live in registers; centered variance).
    if norm_type == 'gLN':
        n = H * K_out
        mean = jnp.sum(z) / n
        cen = z - mean
        if K_out < Kb:
            cen = jnp.where(live, cen, 0.0)
        inv = jax.lax.rsqrt(jnp.sum(cen * cen) / n + EPS)            # scalar
    else:  # 'cLN': per-time-step stats over channels
        mean = jnp.mean(z, axis=0, keepdims=True)                    # [1, Kb]
        cen = z - mean
        inv = jax.lax.rsqrt(jnp.mean(cen * cen, axis=0, keepdims=True) + EPS)

    # Pointwise 1x1 conv on the MXU (bf16 in, f32 accum).  gamma lives in wpg,
    # beta in biasp, and the rsqrt scale is applied on the small [B, Kb] result.
    o = jnp.dot(wpg_ref[...], cen.astype(jnp.bfloat16),
                preferred_element_type=jnp.float32)
    o_ref[...] = o * inv + biasp_ref[...]


# ----------------------------------------------------------------------------
# Wrapper
# ----------------------------------------------------------------------------
def cond_dwsep_forward(params, x, query, *, kernel_size, stride, padding, dilation,
                       norm_type='gLN', causal=False):
    """x: [M*topk, H, K]  query: [M, topk, 512]  ->  [M*topk, B, K_out]."""
    if stride != 1:
        raise NotImplementedError("stride != 1 not supported")  # TODO(synk)
    if norm_type not in ('gLN', 'cLN'):
        # TODO(synk): nn.BatchNorm1d branch (batch statistics) not implemented.
        raise NotImplementedError("only gLN / cLN norm_type supported")

    MT, H, K_in = x.shape
    M, topk, E = query.shape
    assert MT == M * topk
    Bc = params['wp'].shape[0]
    P, dil = kernel_size, dilation
    # PyTorch pads both sides; causal then chomps the last `padding` outputs,
    # which is equivalent to left-pad only.
    pad_left = padding
    pad_right = 0 if causal else padding
    K_out = K_in + pad_left + pad_right - dil * (P - 1)
    if not (0 < K_out <= K_in):
        raise NotImplementedError("padding wider than the receptive field is not supported")
    if dil * (P - 1) >= K_in or pad_left >= K_in:
        raise NotImplementedError("receptive field must be shorter than the input")

    # Lane-align the time axis so output stores are dense vst (only copies x when
    # K is not already a multiple of 128).
    Kb = ((K_in + 127) // 128) * 128
    if Kb != K_in:
        x = jnp.pad(x, ((0, 0), (0, 0), (0, Kb - K_in)))

    # ---- speaker-embedding linears: one fused [E, 2H] bf16 matmul ----
    w_ab = jnp.concatenate([params['wa'], params['wb']], axis=1).astype(jnp.bfloat16)
    b_ab = jnp.concatenate([params['ba'], params['bb']], axis=1)
    q2d = query.reshape(MT, E)          # row-major, same order as torch query.view(-1, 512)
    ab = pl.pallas_call(
        _query_linear_kernel,
        out_shape=jax.ShapeDtypeStruct((MT, 2 * H), jnp.float32),
    )(q2d, w_ab, b_ab)
    a3 = ab[:, :H, None]                # [MT, H, 1]
    b3 = ab[:, H:, None]

    # ---- fold LN affine params into the pointwise conv (tiny, once per call) ----
    wp = params['wp']
    wp_g = (wp * params['gln_g'].reshape(1, H)).astype(jnp.bfloat16)   # [B, H]
    bias_p = wp @ params['gln_b'].reshape(H, 1)                        # [B, 1]

    kernel = functools.partial(
        _cond_dwsep_kernel, P=P, dil=dil, pad_left=pad_left,
        K_in=K_in, K_out=K_out, norm_type=norm_type)

    # Double-buffered in/out blocks + elementwise temps, with headroom; clamp to
    # something safe on every generation (v7x physical VMEM is 64 MiB).
    vmem_est = 4 * Kb * (10 * H + 2 * Bc) + (4 << 20)
    vmem_limit = int(min(max(vmem_est, 32 << 20), 64 << 20))

    out = pl.pallas_call(
        kernel,
        out_shape=jax.ShapeDtypeStruct((MT, Bc, Kb), jnp.float32),
        grid=(MT,),
        in_specs=[
            pl.BlockSpec((None, H, Kb), lambda m: (m, 0, 0)),   # x
            pl.BlockSpec((H, P), lambda m: (0, 0)),             # depthwise weight
            pl.BlockSpec((None, H, 1), lambda m: (m, 0, 0)),    # a (conditioning scale)
            pl.BlockSpec((None, H, 1), lambda m: (m, 0, 0)),    # b (conditioning bias)
            pl.BlockSpec((1, 1), lambda m: (0, 0)),             # PReLU alpha
            pl.BlockSpec((Bc, H), lambda m: (0, 0)),            # wp * gamma (bf16)
            pl.BlockSpec((Bc, 1), lambda m: (0, 0)),            # wp @ beta
        ],
        out_specs=pl.BlockSpec((None, Bc, Kb), lambda m: (m, 0, 0)),
        compiler_params=pltpu.CompilerParams(
            dimension_semantics=("parallel",),     # v7x: 2 TCs split the batch axis
            vmem_limit_bytes=vmem_limit),
    )(x, params['wd'], a3, b3, params['alpha'], wp_g, bias_p)

    if K_out < Kb:
        out = out[:, :, :K_out]
    return out


# ----------------------------------------------------------------------------
# Pure-JAX reference (mirrors the PyTorch module) and parameter init
# ----------------------------------------------------------------------------
def _reference(params, x, query, *, kernel_size, stride, padding, dilation,
               norm_type, causal):
    P, dil = kernel_size, dilation
    MT, H, K = x.shape
    E = query.shape[-1]
    q2d = query.reshape(-1, E)
    a = (q2d @ params['wa'] + params['ba'])[:, :, None]
    b = (q2d @ params['wb'] + params['bb'])[:, :, None]
    pad_l = padding
    pad_r = 0 if causal else padding
    K_out = K + pad_l + pad_r - dil * (P - 1)
    xp = jnp.pad(x, ((0, 0), (0, 0), (pad_l, pad_r)))
    y = jnp.zeros((MT, H, K_out), jnp.float32)
    for p in range(P):
        y = y + params['wd'][None, :, p, None] * xp[:, :, p * dil:p * dil + K_out]
    z = a * y + b
    alpha = params['alpha'][0, 0]
    z = jnp.where(z >= 0, z, alpha * z)
    if norm_type == 'gLN':
        mean = jnp.mean(z, axis=(1, 2), keepdims=True)
        var = jnp.mean((z - mean) ** 2, axis=(1, 2), keepdims=True)
    else:
        mean = jnp.mean(z, axis=1, keepdims=True)
        var = jnp.mean((z - mean) ** 2, axis=1, keepdims=True)
    zn = params['gln_g'] * (z - mean) / jnp.sqrt(var + EPS) + params['gln_b']
    return jnp.einsum('bh,mhk->mbk', params['wp'], zn)


def init_params(key, H, B, P, E=512):
    ks = jax.random.split(key, 8)
    rnd = lambda k, shape, fan: (jax.random.normal(k, shape) / math.sqrt(fan)).astype(jnp.float32)
    return {
        'wd': rnd(ks[0], (H, P), P),                     # depthwise Conv1d weight [H,1,P] -> [H,P]
        'wa': rnd(ks[1], (E, H), E),                     # linear_a.weight.T
        'ba': rnd(ks[2], (1, H), E),                     # linear_a.bias
        'wb': rnd(ks[3], (E, H), E),                     # linear_b.weight.T
        'bb': rnd(ks[4], (1, H), E),                     # linear_b.bias
        'alpha': jnp.full((1, 1), 0.25, jnp.float32),    # nn.PReLU() shared alpha
        # Non-trivial gamma/beta so the wrapper-side folding is actually exercised.
        'gln_g': (1.0 + 0.1 * jax.random.normal(ks[5], (1, H, 1))).astype(jnp.float32),
        'gln_b': (0.1 * jax.random.normal(ks[6], (1, H, 1))).astype(jnp.float32),
        'wp': rnd(ks[7], (B, H), H),                     # pointwise Conv1d weight [B,H,1] -> [B,H]
    }


# ----------------------------------------------------------------------------
if __name__ == "__main__":
    H, Bc, P, dil = 32, 16, 3, 2
    M, topk, E = 2, 2, 512
    key = jax.random.PRNGKey(0)
    kp, kx, kq = jax.random.split(key, 3)
    params = init_params(kp, H, Bc, P, E)
    query = jax.random.normal(kq, (M, topk, E), dtype=jnp.float32)

    # Case 1: non-causal gLN, K already lane-aligned (K_out == K == 128).
    K1 = 128
    pad1 = (P - 1) * dil // 2
    x1 = jax.random.normal(kx, (M * topk, H, K1), dtype=jnp.float32)
    fwd1 = jax.jit(functools.partial(
        cond_dwsep_forward, kernel_size=P, stride=1, padding=pad1,
        dilation=dil, norm_type='gLN', causal=False))
    out1 = fwd1(params, x1, query)
    jax.block_until_ready(out1)
    assert out1.shape == (M * topk, Bc, K1), out1.shape
    assert bool(jnp.all(jnp.isfinite(out1)))
    ref1 = _reference(params, x1, query, kernel_size=P, stride=1, padding=pad1,
                      dilation=dil, norm_type='gLN', causal=False)
    err1 = float(jnp.max(jnp.abs(out1 - ref1)))
    assert err1 < 2e-1, f"gLN max|out-ref| = {err1}"

    # Case 2: causal cLN with an unaligned K (exercises pad-to-128 + masked stats).
    K2 = 96
    pad2 = (P - 1) * dil
    x2 = jax.random.normal(jax.random.PRNGKey(1), (M * topk, H, K2), dtype=jnp.float32)
    fwd2 = jax.jit(functools.partial(
        cond_dwsep_forward, kernel_size=P, stride=1, padding=pad2,
        dilation=dil, norm_type='cLN', causal=True))
    out2 = fwd2(params, x2, query)
    jax.block_until_ready(out2)
    assert out2.shape == (M * topk, Bc, K2), out2.shape
    assert bool(jnp.all(jnp.isfinite(out2)))
    ref2 = _reference(params, x2, query, kernel_size=P, stride=1, padding=pad2,
                      dilation=dil, norm_type='cLN', causal=True)
    err2 = float(jnp.max(jnp.abs(out2 - ref2)))
    assert err2 < 2e-1, f"cLN max|out-ref| = {err2}"

    print("KERNEL_OK")
</pallas_src>

<mosaic_0001>
module attributes {stable_mosaic.version = 11 : i64} {
  func.func @_query_linear_kernel(%arg0: memref<4x512xf32, #tpu.memory_space<vmem>>, %arg1: memref<512x64xbf16, #tpu.memory_space<vmem>>, %arg2: memref<1x64xf32, #tpu.memory_space<vmem>>, %arg3: memref<4x64xf32, #tpu.memory_space<vmem>>) attributes {dimension_semantics = [], scalar_prefetch = 0 : i64, scratch_operands = 0 : i64, tpu.core_type = #tpu.core_type<tc>} {
    %c0 = arith.constant 0 : index
    %c0_0 = arith.constant 0 : index
    %0 = vector.load %arg0[%c0, %c0_0] : memref<4x512xf32, #tpu.memory_space<vmem>>, vector<4x512xf32>
    %1 = arith.truncf %0 : vector<4x512xf32> to vector<4x512xbf16>
    %c0_1 = arith.constant 0 : index
    %c0_2 = arith.constant 0 : index
    %2 = vector.load %arg1[%c0_1, %c0_2] : memref<512x64xbf16, #tpu.memory_space<vmem>>, vector<512x64xbf16>
    %cst = arith.constant dense<0.000000e+00> : vector<4x64xf32>
    %3 = tpu.matmul %1, %2, %cst {dimension_numbers = #tpu.dot_dimension_numbers<[1], [0], [0], [1], [0, 0, 1, 1], [], []>} : vector<4x512xbf16>, vector<512x64xbf16>, vector<4x64xf32> -> vector<4x64xf32>
    %c0_3 = arith.constant 0 : index
    %c0_4 = arith.constant 0 : index
    %4 = vector.load %arg2[%c0_3, %c0_4] : memref<1x64xf32, #tpu.memory_space<vmem>>, vector<1x64xf32>
    %5 = vector.broadcast %4 : vector<1x64xf32> to vector<4x64xf32>
    %6 = arith.addf %3, %5 : vector<4x64xf32>
    %c0_5 = arith.constant 0 : index
    %c0_6 = arith.constant 0 : index
    %7 = vector.load %arg3[%c0_5, %c0_6] : memref<4x64xf32, #tpu.memory_space<vmem>>, vector<4x64xf32>
    tpu.vector_store %arg3[%c0_5, %c0_6], %6 {strides = array<i32>} : memref<4x64xf32, #tpu.memory_space<vmem>>, vector<4x64xf32>,
    return
  }
}

module attributes {stable_mosaic.version = 11 : i64} {
  func.func @_cond_dwsep_kernel(%arg0: i32, %arg1: memref<1x32x128xf32, #tpu.memory_space<vmem>>, %arg2: memref<32x3xf32, #tpu.memory_space<vmem>>, %arg3: memref<1x32x1xf32, #tpu.memory_space<vmem>>, %arg4: memref<1x32x1xf32, #tpu.memory_space<vmem>>, %arg5: memref<1x1xf32, #tpu.memory_space<vmem>>, %arg6: memref<16x32xbf16, #tpu.memory_space<vmem>>, %arg7: memref<16x1xf32, #tpu.memory_space<vmem>>, %arg8: memref<1x16x128xf32, #tpu.memory_space<vmem>>) attributes {dimension_semantics = [#tpu.dimension_semantics<parallel>], iteration_bounds = array<i64: 4>, scalar_prefetch = 0 : i64, scratch_operands = 0 : i64, tpu.core_type = #tpu.core_type<tc>, window_params = [{transform_indices = @transform_0, window_bounds = array<i64: 1, 32, 128>}, {pipeline_mode = #tpu.pipeline_mode<synchronous>, transform_indices = @transform_1, window_bounds = array<i64: 32, 3>}, {transform_indices = @transform_2, window_bounds = array<i64: 1, 32, 1>}, {transform_indices = @transform_3, window_bounds = array<i64: 1, 32, 1>}, {pipeline_mode = #tpu.pipeline_mode<synchronous>, transform_indices = @transform_4, window_bounds = array<i64: 1, 1>}, {pipeline_mode = #tpu.pipeline_mode<synchronous>, transform_indices = @transform_5, window_bounds = array<i64: 16, 32>}, {pipeline_mode = #tpu.pipeline_mode<synchronous>, transform_indices = @transform_6, window_bounds = array<i64: 16, 1>}, {transform_indices = @transform_7, window_bounds = array<i64: 1, 16, 128>}]} {
    %c0 = arith.constant 0 : index
    %c0_0 = arith.constant 0 : index
    %c0_1 = arith.constant 0 : index
    %0 = vector.load %arg1[%c0, %c0_0, %c0_1] : memref<1x32x128xf32, #tpu.memory_space<vmem>>, vector<1x32x128xf32>
    %1 = vector.shape_cast %0 : vector<1x32x128xf32> to vector<32x128xf32>
    %2 = tpu.iota {dimensions = array<i32: 1>} : vector<1x128xi32>
    %c0_2 = arith.constant 0 : index
    %c0_3 = arith.constant 0 : index
    %c0_4 = arith.constant 0 : index
    %3 = vector.load %arg3[%c0_2, %c0_3, %c0_4] : memref<1x32x1xf32, #tpu.memory_space<vmem>>, vector<1x32x1xf32>
    %4 = vector.shape_cast %3 : vector<1x32x1xf32> to vector<32x1xf32>
    %c0_5 = arith.constant 0 : index
    %c0_6 = arith.constant 0 : index
    %5 = vector.load %arg2[%c0_5, %c0_6] : memref<32x3xf32, #tpu.memory_space<vmem>>, vector<32x3xf32>
    %6 = vector.broadcast %4 : vector<32x1xf32> to vector<32x3xf32>
    %7 = arith.mulf %6, %5 : vector<32x3xf32>
    %c2_i32 = arith.constant 2 : i32
    %8 = tpu.dynamic_rotate %1 by %c2_i32 dim 1 : vector<32x128xf32>, i32 -> vector<32x128xf32>
    %c2_i32_7 = arith.constant 2 : i32
    %9 = vector.broadcast %c2_i32_7 : i32 to vector<1x128xi32>
    %10 = arith.cmpi sge, %2, %9 : vector<1x128xi32>
    %cst = arith.constant 0.000000e+00 : f32
    %11 = vector.shape_cast %10 : vector<1x128xi1> to vector<1x128xi1>
    %12 = vector.broadcast %11 : vector<1x128xi1> to vector<32x128xi1>
    %13 = vector.broadcast %cst : f32 to vector<32x128xf32>
    %14 = arith.select %12, %8, %13 : vector<32x128xi1>, vector<32x128xf32>
    %15 = vector.extract_strided_slice %7 {offsets = [0, 0], sizes = [32, 1], strides = [1, 1]} : vector<32x3xf32> to vector<32x1xf32>
    %16 = vector.broadcast %15 : vector<32x1xf32> to vector<32x128xf32>
    %17 = arith.mulf %16, %14 : vector<32x128xf32>
    %18 = vector.extract_strided_slice %7 {offsets = [0, 1], sizes = [32, 1], strides = [1, 1]} : vector<32x3xf32> to vector<32x1xf32>
    %19 = vector.broadcast %18 : vector<32x1xf32> to vector<32x128xf32>
    %20 = arith.mulf %19, %1 : vector<32x128xf32>
    %21 = arith.addf %17, %20 : vector<32x128xf32>
    %c126_i32 = arith.constant 126 : i32
    %22 = tpu.dynamic_rotate %1 by %c126_i32 dim 1 : vector<32x128xf32>, i32 -> vector<32x128xf32>
    %c126_i32_8 = arith.constant 126 : i32
    %23 = vector.broadcast %c126_i32_8 : i32 to vector<1x128xi32>
    %24 = arith.cmpi slt, %2, %23 : vector<1x128xi32>
    %cst_9 = arith.constant 0.000000e+00 : f32
    %25 = vector.shape_cast %24 : vector<1x128xi1> to vector<1x128xi1>
    %26 = vector.broadcast %25 : vector<1x128xi1> to vector<32x128xi1>
    %27 = vector.broadcast %cst_9 : f32 to vector<32x128xf32>
    %28 = arith.select %26, %22, %27 : vector<32x128xi1>, vector<32x128xf32>
    %29 = vector.extract_strided_slice %7 {offsets = [0, 2], sizes = [32, 1], strides = [1, 1]} : vector<32x3xf32> to vector<32x1xf32>
    %30 = vector.broadcast %29 : vector<32x1xf32> to vector<32x128xf32>
    %31 = arith.mulf %30, %28 : vector<32x128xf32>
    %32 = arith.addf %21, %31 : vector<32x128xf32>
    %c0_10 = arith.constant 0 : index
    %c0_11 = arith.constant 0 : index
    %c0_12 = arith.constant 0 : index
    %33 = vector.load %arg4[%c0_10, %c0_11, %c0_12] : memref<1x32x1xf32, #tpu.memory_space<vmem>>, vector<1x32x1xf32>
    %34 = vector.shape_cast %33 : vector<1x32x1xf32> to vector<32x1xf32>
    %35 = vector.broadcast %34 : vector<32x1xf32> to vector<32x128xf32>
    %36 = arith.addf %32, %35 : vector<32x128xf32>
    %cst_13 = arith.constant 0.000000e+00 : f32
    %37 = vector.broadcast %cst_13 : f32 to vector<32x128xf32>
    %38 = arith.cmpf oge, %36, %37 : vector<32x128xf32>
    %c0_14 = arith.constant 0 : index
    %c0_15 = arith.constant 0 : index
    %39 = vector.load %arg5[%c0_14, %c0_15] : memref<1x1xf32, #tpu.memory_space<vmem>>, vector<1x1xf32>
    %40 = vector.broadcast %39 : vector<1x1xf32> to vector<32x128xf32>
    %41 = arith.mulf %40, %36 : vector<32x128xf32>
    %42 = arith.select %38, %36, %41 : vector<32x128xi1>, vector<32x128xf32>
    %43 = vector.shape_cast %42 : vector<32x128xf32> to vector<1x32x128xf32>
    %cst_16 = arith.constant dense<0.000000e+00> : vector<1xf32>
    %44 = vector.multi_reduction <add>, %43, %cst_16 [1, 2] : vector<1x32x128xf32> to vector<1xf32>
    %45 = vector.shape_cast %44 : vector<1xf32> to vector<1x1x1xf32>
    %46 = vector.extract %45[0, 0, 0] : f32 from vector<1x1x1xf32>
    %cst_17 = arith.constant 4.096000e+03 : f32
    %47 = arith.divf %46, %cst_17 : f32
    %48 = vector.broadcast %47 : f32 to vector<32x128xf32>
    %49 = arith.subf %42, %48 : vector<32x128xf32>
    %50 = arith.mulf %49, %49 : vector<32x128xf32>
    %51 = vector.shape_cast %50 : vector<32x128xf32> to vector<1x32x128xf32>
    %cst_18 = arith.constant dense<0.000000e+00> : vector<1xf32>
    %52 = vector.multi_reduction <add>, %51, %cst_18 [1, 2] : vector<1x32x128xf32> to vector<1xf32>
    %53 = vector.shape_cast %52 : vector<1xf32> to vector<1x1x1xf32>
    %54 = vector.extract %53[0, 0, 0] : f32 from vector<1x1x1xf32>
    %cst_19 = arith.constant 4.096000e+03 : f32
    %55 = arith.divf %54, %cst_19 : f32
    %cst_20 = arith.constant 9.99999993E-9 : f32
    %56 = arith.addf %55, %cst_20 : f32
    %57 = math.rsqrt %56 : f32
    %c0_21 = arith.constant 0 : index
    %c0_22 = arith.constant 0 : index
    %58 = vector.load %arg6[%c0_21, %c0_22] : memref<16x32xbf16, #tpu.memory_space<vmem>>, vector<16x32xbf16>
    %59 = arith.truncf %49 : vector<32x128xf32> to vector<32x128xbf16>
    %cst_23 = arith.constant dense<0.000000e+00> : vector<16x128xf32>
    %60 = tpu.matmul %58, %59, %cst_23 {dimension_numbers = #tpu.dot_dimension_numbers<[1], [0], [0], [1], [0, 0, 1, 1], [], []>} : vector<16x32xbf16>, vector<32x128xbf16>, vector<16x128xf32> -> vector<16x128xf32>
    %61 = vector.broadcast %57 : f32 to vector<16x128xf32>
    %62 = arith.mulf %60, %61 : vector<16x128xf32>
    %c0_24 = arith.constant 0 : index
    %c0_25 = arith.constant 0 : index
    %63 = vector.load %arg7[%c0_24, %c0_25] : memref<16x1xf32, #tpu.memory_space<vmem>>, vector<16x1xf32>
    %64 = vector.broadcast %63 : vector<16x1xf32> to vector<16x128xf32>
    %65 = arith.addf %62, %64 : vector<16x128xf32>
    %c0_26 = arith.constant 0 : index
    %c0_27 = arith.constant 0 : index
    %c0_28 = arith.constant 0 : index
    %66 = vector.load %arg8[%c0_26, %c0_27, %c0_28] : memref<1x16x128xf32, #tpu.memory_space<vmem>>, vector<1x16x128xf32>
    %67 = vector.shape_cast %66 : vector<1x16x128xf32> to vector<16x128xf32>
    %68 = vector.shape_cast %65 : vector<16x128xf32> to vector<1x16x128xf32>
    tpu.vector_store %arg8[%c0_26, %c0_27, %c0_28], %68 {strides = array<i32>} : memref<1x16x128xf32, #tpu.memory_space<vmem>>, vector<1x16x128xf32>,
    return
  }
  func.func @transform_0(%arg0: i32) -> (i32, i32, i32) {
    %c0_i32 = arith.constant 0 : i32
    %c0_i32_0 = arith.constant 0 : i32
    %c0_i32_1 = arith.constant 0 : i32
    return %arg0, %c0_i32, %c0_i32_0 : i32, i32, i32
  }
  func.func @transform_1(%arg0: i32) -> (i32, i32) {
    %c0_i32 = arith.constant 0 : i32
    %c0_i32_0 = arith.constant 0 : i32
    %c0_i32_1 = arith.constant 0 : i32
    return %c0_i32, %c0_i32_0 : i32, i32
  }
  func.func @transform_2(%arg0: i32) -> (i32, i32, i32) {
    %c0_i32 = arith.constant 0 : i32
    %c0_i32_0 = arith.constant 0 : i32
    %c0_i32_1 = arith.constant 0 : i32
    return %arg0, %c0_i32, %c0_i32_0 : i32, i32, i32
  }
  func.func @transform_3(%arg0: i32) -> (i32, i32, i32) {
    %c0_i32 = arith.constant 0 : i32
    %c0_i32_0 = arith.constant 0 : i32
    %c0_i32_1 = arith.constant 0 : i32
    return %arg0, %c0_i32, %c0_i32_0 : i32, i32, i32
  }
  func.func @transform_4(%arg0: i32) -> (i32, i32) {
    %c0_i32 = arith.constant 0 : i32
    %c0_i32_0 = arith.constant 0 : i32
    %c0_i32_1 = arith.constant 0 : i32
    return %c0_i32, %c0_i32_0 : i32, i32
  }
  func.func @transform_5(%arg0: i32) -> (i32, i32) {
    %c0_i32 = arith.constant 0 : i32
    %c0_i32_0 = arith.constant 0 : i32
    %c0_i32_1 = arith.constant 0 : i32
    return %c0_i32, %c0_i32_0 : i32, i32
  }
  func.func @transform_6(%arg0: i32) -> (i32, i32) {
    %c0_i32 = arith.constant 0 : i32
    %c0_i32_0 = arith.constant 0 : i32
    %c0_i32_1 = arith.constant 0 : i32
    return %c0_i32, %c0_i32_0 : i32, i32
  }
  func.func @transform_7(%arg0: i32) -> (i32, i32, i32) {
    %c0_i32 = arith.constant 0 : i32
    %c0_i32_0 = arith.constant 0 : i32
    %c0_i32_1 = arith.constant 0 : i32
    return %arg0, %c0_i32, %c0_i32_0 : i32, i32, i32
  }
}

</mosaic_0001>

<bundles_post_ra>
// kernel: cond_dwsep_forward.2
= control target key start
LH: loop header
LB: loop body
LE: loop exit
PB: predicated region body
PF: predicated region fallthrough
CT: control target
= control target key end

     0   :  { %vm370_vm0 = vcmask 519168   ;;  %s615_s1 = inlined_call_operand.vmem [shape: bf16[512,64], index: 1, kind: input, shape index: {}]   ;;  %s616_s0 = inlined_call_operand.vmem [shape: f32[4,512], index: 0, kind: input, shape index: {}]   ;;  %s617_s2 = inlined_call_operand.vmem [shape: f32[1,64], index: 2, kind: input, shape index: {}]   ;;  %s618_s3 = inlined_call_operand.vmem [shape: f32[4,64], index: 3, kind: output, shape index: {}]  }
   0x1   :  { %v453_v0 = vld [vmem:[%s615_s1 + $0x40] sm:$0xff]   ;;  %v457_v4 = vld [vmem:[%s615_s1 + $0x48] sm:$0xff]   ;;  %v461_v8 = vld [vmem:[%s615_s1 + $0x50] sm:$0xff]  }
   0x2   :  { %v454_v1 = vld [vmem:[%s615_s1 + $0xc0] sm:$0xff]   ;;  %409 = vmatprep.subr.bf16.mxu0 %v453_v0  ;;  %v458_v5 = vld [vmem:[%s615_s1 + $0xc8] sm:$0xff]   ;;  %v462_v9 = vld [vmem:[%s615_s1 + $0xd0] sm:$0xff]  }
   0x3   :  { %v455_v2 = vld [vmem:[%s615_s1] sm:$0xff]   ;;  %431 = vmatprep.subr.bf16.mxu1 %v454_v1  ;;  %v459_v6 = vld [vmem:[%s615_s1 + $0x8] sm:$0xff]   ;;  %v463_v10 = vld [vmem:[%s615_s1 + $0x10] sm:$0xff]  }
   0x4   :  { %v456_v3 = vld [vmem:[%s615_s1 + $0x80] sm:$0xff]   ;;  %410 = vmatpush3.bf16.msra.mxu0 %v455_v2  ;;  %v460_v7 = vld [vmem:[%s615_s1 + $0x88] sm:$0xff]   ;;  %v464_v11 = vld [vmem:[%s615_s1 + $0x90] sm:$0xff]  }
   0x5   :  { %432 = vmatpush3.bf16.msra.mxu1 %v456_v3  ;;  %411 = vmatprep.subr.bf16.mxu0 %v457_v4  ;;  %v465_v12 = vld [vmem:[%s615_s1 + $0x58] sm:$0xff]   ;;  %v469_v16 = vld [vmem:[%s615_s1 + $0x60] sm:$0xff]   ;;  %v473_v20 = vld [vmem:[%s615_s1 + $0x68] sm:$0xff]  }
   0x6   :  { %433 = vmatprep.subr.bf16.mxu1 %v458_v5  ;;  %v466_v13 = vld [vmem:[%s615_s1 + $0xd8] sm:$0xff]   ;;  %v470_v17 = vld [vmem:[%s615_s1 + $0xe0] sm:$0xff]   ;;  %v474_v21 = vld [vmem:[%s615_s1 + $0xe8] sm:$0xff]  }
   0x7   :  { %v467_v14 = vld [vmem:[%s615_s1 + $0x18] sm:$0xff]   ;;  %v471_v18 = vld [vmem:[%s615_s1 + $0x20] sm:$0xff]   ;;  %v475_v22 = vld [vmem:[%s615_s1 + $0x28] sm:$0xff]  }
   0x8   :  { %412 = vmatpush3.bf16.msra.mxu0 %v459_v6  ;;  %v468_v15 = vld [vmem:[%s615_s1 + $0x98] sm:$0xff]   ;;  %v472_v19 = vld [vmem:[%s615_s1 + $0xa0] sm:$0xff]   ;;  %v476_v23 = vld [vmem:[%s615_s1 + $0xa8] sm:$0xff]  }
   0x9   :  { %434 = vmatpush3.bf16.msra.mxu1 %v460_v7  ;;  %413 = vmatprep.subr.bf16.mxu0 %v461_v8  ;;  %v477_v24 = vld [vmem:[%s615_s1 + $0x70] sm:$0xff]   ;;  %v481_v28 = vld [vmem:[%s615_s1 + $0x78] sm:$0xff]   ;;  %v15_v32 = vld [vmem:[%s616_s0] sm:$0xff] }
   0xa   :  { %435 = vmatprep.subr.bf16.mxu1 %v462_v9  ;;  %v478_v25 = vld [vmem:[%s615_s1 + $0xf0] sm:$0xff]   ;;  %v482_v29 = vld [vmem:[%s615_s1 + $0xf8] sm:$0xff]   ;;  %v16_v33 = vld [vmem:[%s616_s0 + $0x8] sm:$0xff]  ;;  %v19_v34 = vcombine.high %v15_v32, %v15_v32  ;;  %v23_v36 = vpack.c.bf16 %v15_v32, %v15_v32 }
   0xb   :  { %v479_v26 = vld [vmem:[%s615_s1 + $0x30] sm:$0xff]   ;;  %v483_v30 = vld [vmem:[%s615_s1 + $0x38] sm:$0xff]   ;;  %v20_v35 = vcombine.high %v16_v33, %v16_v33  ;;  %v25_v37 = vpack.c.bf16 %v16_v33, %v16_v33  ;;  %v376_v42 = vld [vmem:[%s617_s2] ss:$0 sm:$0xff] }
   0xc   :  { %414 = vmatpush3.bf16.msra.mxu0 %v463_v10  ;;  %v480_v27 = vld [vmem:[%s615_s1 + $0xb0] sm:$0xff]   ;;  %v484_v31 = vld [vmem:[%s615_s1 + $0xb8] sm:$0xff]   ;;  %v24_v38 = vpack.c.bf16 %v19_v34, %v19_v34 }
   0xd   :  { %436 = vmatpush3.bf16.msra.mxu1 %v464_v11  ;;  %415 = vmatprep.subr.bf16.mxu0 %v465_v12  ;;  %v26_v39 = vpack.c.bf16 %v20_v35, %v20_v35 }
   0xe   :  { %437 = vmatprep.subr.bf16.mxu1 %v466_v13  ;;  %322 = vmatprep.mubr.bf16.mxu0 %v24_v38 }
   0xf   :  { %362 = vmatprep.mubr.bf16.mxu1 %v26_v39 }
  0x10   :  { %416 = vmatpush3.bf16.msra.mxu0 %v467_v14 }
  0x11   :  { %438 = vmatpush3.bf16.msra.mxu1 %v468_v15  ;;  %417 = vmatprep.subr.bf16.mxu0 %v469_v16 }
  0x12   :  { %439 = vmatprep.subr.bf16.mxu1 %v470_v17 }
  0x14   :  { %418 = vmatpush3.bf16.msra.mxu0 %v471_v18 }
  0x15   :  { %440 = vmatpush3.bf16.msra.mxu1 %v472_v19  ;;  %419 = vmatprep.subr.bf16.mxu0 %v473_v20 }
  0x16   :  { %441 = vmatprep.subr.bf16.mxu1 %v474_v21 }
  0x18   :  { %420 = vmatpush3.bf16.msra.mxu0 %v475_v22 }
  0x19   :  { %442 = vmatpush3.bf16.msra.mxu1 %v476_v23  ;;  %421 = vmatprep.subr.bf16.mxu0 %v477_v24 }
  0x1a   :  { %443 = vmatprep.subr.bf16.mxu1 %v478_v25 }
  0x1c   :  { %422 = vmatpush3.bf16.msra.mxu0 %v479_v26 }
  0x1d   :  { %444 = vmatpush3.bf16.msra.mxu1 %v480_v27  ;;  %423 = vmatprep.subr.bf16.mxu0 %v481_v28 }
  0x1e   :  { %445 = vmatprep.subr.bf16.mxu1 %v482_v29 }
  0x20   :  { %424 = vmatpush3.bf16.msra.mxu0 %v483_v30 }
  0x21   :  { %446 = vmatpush3.bf16.msra.mxu1 %v484_v31 }
  0x23   :  { %323 = vmatmul.mubr.bf16.vlgmr.msra.gmra.mrb[0].mxu0 %v23_v36 }
  0x24   :  { %363 = vmatmul.mubr.bf16.vlgmr.msra.gmra.mrb[0].mxu1 %v25_v37 }
  0xf6   :  { %v425_v40 = vpop.f32.mrb[0].mxu0 }
  0xf7   :  { %v447_v41 = vpop.f32.mrb[0].mxu1  ;;  %v426_v43 = vpop.f32.mrb[1].mxu0 }
  0xf8   :  { %v448_v44 = vpop.f32.mrb[1].mxu1  ;;  %v427_v45 = vadd.f32 %v426_v43, %v425_v40  ;;  %v428_v47 = vpop.f32.mrb[2].mxu0 }
  0xf9   :  { %v449_v46 = vadd.f32 %v448_v44, %v447_v41  ;;  %v450_v48 = vpop.f32.mrb[2].mxu1  ;;  %v429_v49 = vpop.f32.mrb[3].mxu0 }
  0xfa   :  { %v451_v50 = vpop.f32.mrb[3].mxu1  ;;  %v325_v51 = vadd.f32 %v427_v45, %v376_v42 }
  0xfc   :  { %v365_v52 = vadd.f32 %v449_v46, %v325_v51 }
  0xfe   :  { %371 = vst.msk [vmem:[%s618_s3] sm:$0xf] %vm370_vm0, %v365_v52 }

// kernel: cond_dwsep_forward.3
= control target key start
LH: loop header
LB: loop body
LE: loop exit
PB: predicated region body
PF: predicated region fallthrough
CT: control target
= control target key end

     0   :  { %s1126_s0 = inlined_call_operand.vmem [shape: f32[4,32,128], index: 0, kind: input, shape index: {}]   ;;  %s1127_s1 = inlined_call_operand.vmem [shape: f32[32,3], index: 1, kind: input, shape index: {}]   ;;  %s1128_s2 = inlined_call_operand.vmem [shape: f32[4,32,1], index: 2, kind: input, shape index: {}]   ;;  %s1129_s3 = inlined_call_operand.vmem [shape: f32[4,32,1], index: 3, kind: input, shape index: {}]   ;;  %s1130_s4 = inlined_call_operand.<no memory space> [shape: f32[1,1], index: 4, kind: input, shape index: {}]   ;;  %s1131_s5 = inlined_call_operand.vmem [shape: bf16[16,32], index: 5, kind: input, shape index: {}]   ;;  %s1132_s6 = inlined_call_operand.vmem [shape: f32[16,1], index: 6, kind: input, shape index: {}]   ;;  %s1133_s7 = inlined_call_operand.hbm [shape: f32[4,16,128], index: 7, kind: output, shape index: {}]  }
   0x1   :  { %v12_v0 = vstv %s1130_s4 }
   0x2   :  { %13 = vst [vmem:[#allocation2] sm:$0x1] %v12_v0 }
   0x3   :  { %14 = vsyncpa [#allocation4], 0 }
   0x4   :  { %16 = vsyncpa [#allocation4 + $0x1], 0  ;;  %s946_s26 = smov 0   ;;  %s948_s27 = smov 0  }
   0x5   :  { %s950_s28 = smov 0   ;;  %s952_s29 = smov 0  }
   0x6 LB: > { %s967_s4 = sadd.s32 4294967295, %s891_s29   ;;  %s726_s30 = sadd.s32 4294967294, %s891_s29   ;;  %s891_s29 = sphi %s952_s29, %s1139_s29   ;;  %s887_s28 = sphi %s950_s28, %s1138_s28   ;;  %s883_s27 = sphi %s948_s27, %s1137_s27   ;;  %s879_s26 = sphi %s946_s26, %s1136_s26  }
   0x7   : > { %s971_s8 = sadd.s32 1, %s891_s29   ;;  %s191_s9 = sadd.s32 1, %s887_s28 }
   0x8   : > { %s188_s10 = ssub.s32 %s891_s29, %s971_s8  ;;  %p201_p0 = scmp.ne.s32.totalorder %s887_s28, %s883_s27 }
   0x9   : > { %p189_p1 = scmp.eq.s32.totalorder %s188_s10, 0  ;;  %p202_p2 = scmp.eq.s32.totalorder %s967_s4, 3 }
   0xa   : > { %p207_p3 = scmp.ne.s32.totalorder %s883_s27, %s879_s26  ;;  %p208_p4 = scmp.eq.s32.totalorder %s726_s30, 3 }
   0xb   : > { %s982_s11 = scalar_select %p189_p1, %s887_s28, %s191_s9  }
   0xc   : > { %p984_p5 = por %p202_p2, %p201_p0  ;;  %p988_p6 = por %p208_p4, %p207_p3 }
   0xd   : > { %p729_p7 = scmp.ge.s32.totalorder %s891_s29, 1  ;;  %p262_p8 = scmp.lt.s32.totalorder %s891_s29, 5 }
   0xf   : > { %p263_p9 = pnand %p729_p7, %p262_p8 }
  0x10   : > { %p304_p10 = scmp.lt.s32.totalorder (!%p263_p9), %s967_s4, 3  ;;  %v893_v1 = vmov (!%p263_p9), 0   ;;  %s894_s25 = smov (!%p263_p9), 2   ;;  %v737_v12 = vld [vmem:[#allocation2] ss:$0 sm:$0xff] (!%p263_p9)  ;;  %v331_v17 = vld [vmem:[%s1127_s1 + $0x8] sm:$0xff] (!%p263_p9)  ;;  %v324_v44 = vlaneseq (!%p263_p9) }
  0x11   : > { %266 = sbr.rel (%p263_p9) target bundleno = 848 (0x350), region = 48  ;;  %815 = vset.pattern.permute.xlu1 (!%p263_p9), %v893_v1  ;;  %814 = vset.pattern.permute.xlu0 (!%p263_p9), %v893_v1  ;;  %s895_s30 = smov (!%p263_p9), 126   ;;  %v330_v14 = vld [vmem:[%s1127_s1] sm:$0xff] (!%p263_p9)  ;;  %v332_v19 = vld [vmem:[%s1127_s1 + $0x10] sm:$0xff] (!%p263_p9)  ;;  %v896_v22 = vmov (!%p263_p9), 1   ;;  %v897_v24 = vmov (!%p263_p9), 2  }
  0x12   : > { %v333_v25 = vld [vmem:[%s1127_s1 + $0x18] sm:$0xff] (!%p263_p9)  ;;  %v325_v46 = vand.u32 (!%p263_p9), 127, %v324_v44  ;;  %vm899_vm6 = vmmov (!%p263_p9), 0   ;;  %vm562_vm7 = vcmask (!%p263_p9), 261120   ;;  %s301_s16 = sand.u32 (!%p263_p9), 1, %s883_s27  }
  0x13   : > { %s730_s17 = sshll.u32 (!%p263_p9), %s301_s16, 4 }
  0x14   : > { %vm366_vm0 = vcmp.ge.s32.totalorder (!%p263_p9), %v325_v46, 2  ;;  %vm429_vm1 = vcmp.lt.s32.totalorder (!%p263_p9), %v325_v46, 126 }
  0x18   : > { %s305_s14 = scalar_select %p304_p10, %s967_s4, 3 }
  0x1a   : > { %s745_s15 = sshll.u32 %s305_s14, 5 }
  0x1b   : > { %s313_s18 = scalar_lea.vmem %s1128_s2, %s745_s15  ;;  %s308_s21 = scalar_lea.vmem %s1126_s0, %s745_s15 }
  0x1c   : > { %v328_v2 = vld [vmem:[%s313_s18 + $0x10] sm:$0xff]  ;;  %v326_v3 = vld [vmem:[%s313_s18] sm:$0xff]  ;;  %v329_v4 = vld [vmem:[%s313_s18 + $0x18] sm:$0xff]  ;;  %s1011_s24 = scalar_lea.vmem %s1129_s3, %s745_s15 }
  0x1d   : > { %346 = vperm.xlu1 %815, %v328_v2   ;;  %336 = vperm.xlu0 %814, %v326_v3   ;;  %v327_v5 = vld [vmem:[%s313_s18 + $0x8] sm:$0xff]  ;;  %v1006_v7 = vld [vmem:[%s308_s21] sm:$0xff]  ;;  %v1017_v10 = vld [vmem:[%s308_s21 + $0x10] sm:$0xff]  ;;  %s303_s18 = scalar_lea.vmem [#allocation3], %s730_s17 }
  0x1e   : > { %v1004_v6 = vld [vmem:[%s308_s21 + $0x8] sm:$0xff]  ;;  %v460_v8 = vld [vmem:[%s1011_s24] sm:$0xff]  ;;  %v462_v11 = vld [vmem:[%s1011_s24 + $0x10] sm:$0xff]  ;;  %s640_s19 = sshll.u32 %s303_s18, 4  ;;  %s1078_s19 = int_to_ptr.vmem [resolvable:$true] %s640_s19 }
  0x1f   : > { %v461_v9 = vld [vmem:[%s1011_s24 + $0x8] sm:$0xff]  ;;  %v1025_v13 = vld [vmem:[%s308_s21 + $0x18] sm:$0xff]  ;;  %s748_s21 = sshll.u32 %s967_s4, 8  ;;  %s1085_s4 = scalar_lea.sflag [#allocation4], %s301_s16 }
  0x20   : > { %v463_v26 = vld [vmem:[%s1011_s24 + $0x18] sm:$0xff]  ;;  %s1083_s24 = scalar_lea.hbm %s1133_s7, %s748_s21 }
  0x21   : > { %351 = vperm.xlu1 %815, %v329_v4   ;;  %341 = vperm.xlu0 %814, %v327_v5  }
  0x25   : > { %360 = vrot.lane.b32.xlu0 %v1004_v6, %s894_s25  ;;  %358 = vrot.lane.b32.xlu1 %v1006_v7, %s894_s25 }
  0x29   : > { %466 = vperm.xlu0 %814, %v460_v8   ;;  %471 = vperm.xlu1 %815, %v461_v9  }
  0x2d   : > { %421 = vrot.lane.b32.xlu0 %v1006_v7, %s895_s30  ;;  %362 = vrot.lane.b32.xlu1 %v1017_v10, %s894_s25 }
  0x31   : > { %476 = vperm.xlu0 %814, %v462_v11   ;;  %423 = vrot.lane.b32.xlu1 %v1004_v6, %s895_s30 }
  0x35   : > { %499 = vperm.xlu1 %815, %v737_v12   ;;  %364 = vrot.lane.b32.xlu0 %v1025_v13, %s894_s25  ;;  %s829_s25 = scalar_lea.vmem %s1078_s19, 256 }
  0x36   : > { %p830_p11 = scmp.ne.s32.totalorder %s1078_s19, %s829_s25 }
  0x38   : > { %p831_p12 = pnand %p830_p11, %p984_p5 }
  0x3a   : > { %p832_p13 = pneg %p831_p12 }
  0x9c   : > { %v337_v15 = vpop.permute.xlu0 %336  ;;  %v347_v21 = vpop.permute.xlu1 %346 }
  0x9d   : > { %v354_v16 = vmul.f32 %v337_v15, %v330_v14  ;;  %v356_v23 = vmul.f32 %v347_v21, %v332_v19 }
  0x9f   : > { %375 = vperm.xlu0 %814, %v354_v16  }
  0xa0   : > { %v342_v18 = vpop.permute.xlu0 %341  ;;  %v352_v27 = vpop.permute.xlu1 %351 }
  0xa1   : > { %v355_v20 = vmul.f32 %v342_v18, %v331_v17  ;;  %v357_v28 = vmul.f32 %v352_v27, %v333_v25 }
  0xa3   : > { %816 = vset.pattern.permute.xlu0 %v896_v22  ;;  %380 = vperm.xlu1 %815, %v355_v20  }
  0xa4   : > { %398 = vperm.xlu0 %816, %v354_v16   ;;  %v359_v29 = vpop.permute.xlu1 %358  ;;  %v361_v31 = vpop.permute.xlu0 %360 }
  0xa5   : > { %v369_v50 = vsel %vm366_vm0, %v359_v29, 0.0  ;;  %v370_v57 = vsel %vm366_vm0, %v361_v31, 0.0 }
  0xa7   : > { %817 = vset.pattern.permute.xlu1 %v896_v22 }
  0xa8   : > { %406 = vperm.xlu0 %816, %v356_v23   ;;  %402 = vperm.xlu1 %817, %v355_v20   ;;  %v472_v30 = vpop.permute.xlu1 %471  ;;  %v467_v33 = vpop.permute.xlu0 %466 }
  0xac   : > { %820 = vset.pattern.permute.xlu0 %v897_v24  ;;  %818 = vset.pattern.permute.xlu1 %v893_v1  ;;  %v363_v32 = vpop.permute.xlu1 %362  ;;  %v422_v35 = vpop.permute.xlu0 %421 }
  0xad   : > { %441 = vperm.xlu0 %820, %v355_v20   ;;  %385 = vperm.xlu1 %818, %v356_v23   ;;  %v432_v51 = vsel %vm429_vm1, %v422_v35, 0.0  ;;  %v610_v35 = vld [vmem:[%s1132_s6] sm:$0xff] }
  0xb0   : > { %v424_v34 = vpop.permute.xlu1 %423  ;;  %v477_v37 = vpop.permute.xlu0 %476 }
  0xb1   : > { %445 = vperm.xlu0 %820, %v356_v23   ;;  %819 = vset.pattern.permute.xlu1 %v897_v24  ;;  %v433_v58 = vsel %vm429_vm1, %v424_v34, 0.0 }
  0xb2   : > { %437 = vperm.xlu1 %819, %v354_v16  }
  0xb4   : > { %v1049_v36 = vpop.permute.xlu1 %499  ;;  %v365_v39 = vpop.permute.xlu0 %364 }
  0xb5   : > { %824 = vset.pattern.permute.xlu0 %v893_v1  ;;  %v372_v15 = vsel %vm366_vm0, %v365_v39, 0.0 }
  0xb6   : > { %821 = vset.pattern.permute.xlu1 %v893_v1  ;;  %481 = vperm.xlu0 %824, %v463_v26  }
  0xb7   : > { %390 = vperm.xlu1 %821, %v357_v28  }
  0xbb   : > { %822 = vset.pattern.permute.xlu1 %v896_v22 }
  0xbc   : > { %410 = vperm.xlu1 %822, %v357_v28  }
  0xc0   : > { %823 = vset.pattern.permute.xlu1 %v897_v24 }
  0xc1   : > { %449 = vperm.xlu1 %823, %v357_v28  }
  0xc5   : > { %425 = vrot.lane.b32.xlu1 %v1017_v10, %s895_s30 }
  0xc6   : > { %825 = vset.pattern.permute.xlu1 %v893_v1  ;;  %v371_v1 = vsel %vm366_vm0, %v363_v32, 0.0 }
  0xc9   : > { %427 = vrot.lane.b32.xlu1 %v1025_v13, %s895_s30  ;;  %s900_s30 = smov [#allocation3]  }
  0xca   : > { %s833_s9 = sshll.u32 %s900_s30, 4  ;;  %s834_s9 = int_to_ptr.vmem [resolvable:$false] %s833_s9 }
  0xcb   : > { %p836_p0 = scmp.lt.s32.totalorder %s1078_s19, %s834_s9 }
 0x11e   : > { %v376_v41 = vpop.permute.xlu0 %375 }
 0x11f   : > { %v393_v54 = vmul.f32 %v376_v41, %v369_v50 }
 0x122   : > { %v381_v38 = vpop.permute.xlu1 %380 }
 0x123   : > { %v399_v43 = vpop.permute.xlu0 %398  ;;  %v394_v59 = vmul.f32 %v381_v38, %v370_v57  ;;  %v826_v57 = vld [vmem:[%s1131_s5] sm:$0xff]  }
 0x124   : > { %v413_v49 = vmul.f32 %v399_v43, %v1006_v7 }
 0x126   : > { %v417_v60 = vadd.f32 %v413_v49, %v393_v54 }
 0x127   : > { %v403_v40 = vpop.permute.xlu1 %402  ;;  %v407_v47 = vpop.permute.xlu0 %406 }
 0x128   : > { %v414_v55 = vmul.f32 %v403_v40, %v1004_v6  ;;  %v415_v2 = vmul.f32 %v407_v47, %v1017_v10 }
 0x12a   : > { %v418_v62 = vadd.f32 %v414_v55, %v394_v59  ;;  %v611_v59 = vld [vmem:[%s1132_s6 + $0x8] sm:$0xff] }
 0x12c   : > { %v386_v42 = vpop.permute.xlu1 %385  ;;  %v442_v52 = vpop.permute.xlu0 %441 }
 0x12d   : > { %v453_v61 = vmul.f32 %v442_v52, %v433_v58  ;;  %v395_v4 = vmul.f32 %v386_v42, %v371_v1 }
 0x12f   : > { %v457_v3 = vadd.f32 %v453_v61, %v418_v62  ;;  %v419_v11 = vadd.f32 %v415_v2, %v395_v4 }
 0x130   : > { %v446_v6 = vpop.permute.xlu0 %445 }
 0x131   : > { %v438_v45 = vpop.permute.xlu1 %437  ;;  %v485_v9 = vadd.f32 %v472_v30, %v457_v3 }
 0x132   : > { %v452_v56 = vmul.f32 %v438_v45, %v432_v51 }
 0x133   : > { %v503_v20 = vmul.f32 %v1049_v36, %v485_v9  ;;  %vm489_vm3 = vcmp.ge.f32.partialorder %v485_v9, 0.0 }
 0x134   : > { %v456_v63 = vadd.f32 %v452_v56, %v417_v60 }
 0x135   : > { %v482_v24 = vpop.permute.xlu0 %481  ;;  %v507_v28 = vsel %vm489_vm3, %v485_v9, %v503_v20 }
 0x136   : > { %v391_v48 = vpop.permute.xlu1 %390  ;;  %v484_v5 = vadd.f32 %v467_v33, %v456_v63 }
 0x137   : > { %v396_v17 = vmul.f32 %v391_v48, %v372_v15 }
 0x138   : > { %v502_v16 = vmul.f32 %v1049_v36, %v484_v5  ;;  %vm488_vm2 = vcmp.ge.f32.partialorder %v484_v5, 0.0 }
 0x13a   : > { %v506_v26 = vsel %vm488_vm2, %v484_v5, %v502_v16 }
 0x13b   : > { %v411_v53 = vpop.permute.xlu1 %410  ;;  %v510_v30 = vadd.f32 %v507_v28, %v506_v26 }
 0x13c   : > { %v416_v12 = vmul.f32 %v411_v53, %v1025_v13 }
 0x13e   : > { %v420_v21 = vadd.f32 %v416_v12, %v396_v17 }
 0x140   : > { %v450_v0 = vpop.permute.xlu1 %449 }
 0x144   : > { %v426_v7 = vpop.permute.xlu1 %425 }
 0x145   : > { %v434_v8 = vsel %vm429_vm1, %v426_v7, 0.0 }
 0x146   : > { %v454_v14 = vmul.f32 %v446_v6, %v434_v8 }
 0x148   : > { %v458_v18 = vadd.f32 %v454_v14, %v419_v11  ;;  %v428_v19 = vpop.permute.xlu1 %427 }
 0x149   : > { %v435_v10 = vsel %vm429_vm1, %v428_v19, 0.0 }
 0x14a   : > { %v486_v22 = vadd.f32 %v477_v37, %v458_v18  ;;  %v455_v23 = vmul.f32 %v450_v0, %v435_v10  ;;  %v898_v37 = vmov 0.0  }
 0x14b   : > { %752 = vmatprep.subr.bf16.mxu0 %v898_v37  ;;  %756 = vmatprep.mubr.msk.bf16.mxu0 %vm899_vm6, %v898_v37 }
 0x14c   : > { %v459_v25 = vadd.f32 %v455_v23, %v420_v21  ;;  %vm490_vm4 = vcmp.ge.f32.partialorder %v486_v22, 0.0  ;;  %v504_v13 = vmul.f32 %v1049_v36, %v486_v22 }
 0x14e   : > { %v487_v27 = vadd.f32 %v482_v24, %v459_v25  ;;  %v508_v29 = vsel %vm490_vm4, %v486_v22, %v504_v13 }
 0x14f   : > { %v511_v32 = vadd.f32 %v510_v30, %v508_v29 }
 0x150   : > { %v505_v31 = vmul.f32 %v1049_v36, %v487_v27  ;;  %vm491_vm5 = vcmp.ge.f32.partialorder %v487_v27, 0.0 }
 0x152   : > { %v509_v33 = vsel %vm491_vm5, %v487_v27, %v505_v31 }
 0x153   : > { %v512_v34 = vadd.f32 %v511_v32, %v509_v33 }
 0x155   : > { %513 = vadd.xlane.f32.xlu0 %v512_v34 }
 0x16b   : > { %614 = vperm.xlu0 %824, %v610_v35  }
 0x1e2   : > { %v514_v38 = vpop.xlane.xlu0 %513 }
 0x1e3   : > { %v515_v39 = vrot.slane %v514_v38, 4 }
 0x1e5   : > { %v516_v40 = vadd.f32 %v515_v39, %v514_v38 }
 0x1e7   : > { %v517_v41 = vrot.slane %v516_v40, 2 }
 0x1e9   : > { %v518_v42 = vadd.f32 %v517_v41, %v516_v40 }
 0x1ea   : > { %v615_v15 = vpop.permute.xlu0 %614 }
 0x1eb   : > { %v519_v36 = vrot.slane %v518_v42, 1 }
 0x1ed   : > { %v520_v43 = vadd.f32 %v519_v36, %v518_v42 }
 0x1ef   : > { %760 = vpush %v520_v43 }
 0x220   : > { %s761_s22 = spop %760 }
 0x221   : > { %s524_s23 = smul.f32 0.00024414063, %s761_s22 }
 0x223   : > { %v525_v44 = vstv %s524_s23 }
 0x224   : > { %v528_v45 = vsub.f32 %v508_v29, %v525_v44  ;;  %v526_v46 = vsub.f32 %v506_v26, %v525_v44  ;;  %v527_v47 = vsub.f32 %v507_v28, %v525_v44  ;;  %v529_v48 = vsub.f32 %v509_v33, %v525_v44 }
 0x226   : > { %v530_v49 = vmul.f32 %v526_v46, %v526_v46  ;;  %v531_v50 = vmul.f32 %v527_v47, %v527_v47  ;;  %v555_v51 = vpack.c.bf16 %v527_v47, %v526_v46  ;;  %v532_v52 = vmul.f32 %v528_v45, %v528_v45 }
 0x227   : > { %v556_v54 = vpack.c.bf16 %v529_v48, %v528_v45  ;;  %v533_v55 = vmul.f32 %v529_v48, %v529_v48 }
 0x228   : > { %753 = vmatpush3.bf16.msra.mxu0 %v555_v51  ;;  %v534_v53 = vadd.f32 %v531_v50, %v530_v49 }
 0x229   : > { %754 = vmatprep.subr.bf16.mxu0 %v898_v37 }
 0x22a   : > { %v535_v56 = vadd.f32 %v534_v53, %v532_v52 }
 0x22c   : > { %755 = vmatpush3.bf16.msra.mxu0 %v556_v54  ;;  %v536_v58 = vadd.f32 %v535_v56, %v533_v55 }
 0x22e   : > { %537 = vadd.xlane.f32.xlu1 %v536_v58 }
 0x22f   : > { %757 = vmatmul.mubr.msk.bf16.vlgmr.msra.gmra.mrb[0].mxu0 %vm562_vm7, %v826_v57 }
 0x23f   : > { %619 = vperm.xlu1 %825, %v611_v59  }
 0x2bb   : > { %v538_v60 = vpop.xlane.xlu1 %537 }
 0x2bc   : > { %v539_v61 = vrot.slane %v538_v60, 4 }
 0x2be   : > { %v540_v62 = vadd.f32 %v539_v61, %v538_v60 }
 0x2bf   : > { %v620_v11 = vpop.permute.xlu1 %619 }
 0x2c0   : > { %v541_v63 = vrot.slane %v540_v62, 2 }
 0x2c2   : > { %v542_v0 = vadd.f32 %v541_v63, %v540_v62 }
 0x2c4   : > { %v543_v1 = vrot.slane %v542_v0, 1 }
 0x2c6   : > { %v544_v2 = vadd.f32 %v543_v1, %v542_v0 }
 0x2c8   : > { %762 = vpush %v544_v2 }
 0x2f9   : > { %s763_s10 = spop %762 }
 0x2fa   : > { %s548_s14 = smul.f32 0.00024414063, %s763_s10  ;;  %s835_s10 = scalar_lea.vmem %s834_s9, 512 }
 0x2fb   : > { %p837_p1 = scmp.lt.s32.totalorder %s835_s10, %s829_s25 }
 0x2fc   : > { %s549_s15 = sadd.f32 1e-08, %s548_s14 }
 0x2fd   : > { %p838_p2 = por %p837_p1, %p836_p0 }
 0x2fe   : > { %v550_v3 = vstv %s549_s15 }
 0x2ff   : > { %827 = vrsqrt.f32 %v550_v3  ;;  %p839_p3 = pnand %p838_p2, %p832_p13 }
 0x302   : > { %v600_v4 = vpop.f32.mrb[0].mxu0 }
 0x303   : > { %v758_v5 = vpop.f32.mrb[1].mxu0 }
 0x304   : > { %v603_v7 = vpop.f32.mrb[2].mxu0 }
 0x305   : > { %v759_v6 = vpop.f32.mrb[3].mxu0 }
 0x309   : > { %v828_v8 = vpop.eup %827 }
 0x30a   : > { %764 = vpush %v828_v8 }
 0x33b   : > { %s765_s20 = spop %764 }
 0x33c   : > { %v607_v9 = vstv %s765_s20 }
 0x33d   : > { %v608_v12 = vmul.f32 %v607_v9, %v600_v4  ;;  %v609_v14 = vmul.f32 %v607_v9, %v603_v7 }
 0x33f   : > { %v622_v16 = vadd.f32 %v615_v15, %v608_v12  ;;  %v623_v17 = vadd.f32 %v620_v11, %v609_v14 }
 0x341   : > { %624 = vst [vmem:[%s303_s18] sm:$0xff] %v622_v16  ;;  %625 = vst [vmem:[%s303_s18 + $0x8] sm:$0xff] %v623_v17 }
 0x342   : > { %842 = shalt.err (!%p839_p3)
}
 0x343   : > { %s843_s14 = scalar_lea.hbm %s1083_s24, 256  ;;  %s847_s17 = scalar_lea.hbm %s1133_s7, 1024 }
 0x344   : > { %p844_p4 = scmp.ne.s32.totalorder %s1083_s24, %s843_s14  ;;  %p848_p9 = scmp.lt.u32.totalorder %s1083_s24, %s1133_s7 }
 0x345   : > { %p849_p10 = scmp.lt.u32.totalorder %s847_s17, %s843_s14  ;;  %p851_p12 = scmp.lt.u32.totalorder %s843_s14, %s1083_s24 }
 0x346   : > { %p845_p7 = pnand %p844_p4, %p984_p5 }
 0x347   : > { %p850_p11 = por %p849_p10, %p848_p9 }
 0x348   : > { %p846_p8 = pneg %p845_p7 }
 0x349   : > { %p852_p13 = por %p851_p12, %p850_p11 }
 0x34b   : > { %p853_p0 = pnand %p852_p13, %p846_p8 }
 0x34d   : > { %856 = shalt.err (!%p853_p0)
}
 0x34e   : > { %s901_s21 = smov 128   ;;  %s902_s22 = smov 8  }
 0x34f   : > { %766 = dma.vmem_to_hbm [thread:$0]  (%p984_p5), %s1078_s19, 256, %s1083_s24, %s1085_s4, %s901_s21, %s901_s21, %s902_s22  }
 0x350 PF: > { %p772_p1 = scmp.ge.s32.totalorder %s891_s29, 2  ;;  %s655_s23 = sand.u32 1, %s879_s26  }
 0x351   : > { %s656_s25 = scalar_lea.sflag [#allocation4], %s655_s23 }
 0x352   : > { %p769_p2 = pnand %p772_p1, %p988_p6 }
 0x354   : > { %874 = dma.done.wait (!%p769_p2), %s656_s25, 256  }
 0x355   : > { %876 = vsyncadd (!%p769_p2), %s656_s25, 4294967040  ;;  %p19_p3 = scmp.ge.s32.totalorder %s971_s8, 6   ;;  %s1136_s26 = smov %s883_s27 }
 0x356   : > { %s1137_s27 = smov %s887_s28  ;;  %s1138_s28 = smov %s982_s11 }
 0x357   : > { %s1139_s29 = smov %s971_s8  ;;  %21 = sbr.rel (!%p19_p3) target bundleno = 6 (0x6), region = 89 }
 0x35e   :  { %661 = vsyncpa [#allocation4], 1 }
 0x35f   :  { %663 = vsyncpa [#allocation4 + $0x1], 1 }

</bundles_post_ra>
